<compile_context>
chip_gen: v7x
topology: tpu7x:2x2x1
jax: 0.10.0
libtpu: 0.0.40
codegen_flags: <defaults>
</compile_context>

<pallas_src>
import functools

import jax
import jax.numpy as jnp
from jax.experimental import pallas as pl
from jax.experimental.pallas import tpu as pltpu


CONFIG = dict(
    num_cosmo_params=4,
    num_bias_params=4,
    num_zbins=3,
    output_kbins=16,          # output_dim = output_kbins * 2 = 32
    mlp_dims=[32, 32, 32],
    num_mlp_blocks=2,
    num_block_layers=2,
    use_skip_connection=True,
)

_LANE = 128                   # vreg lane width; packed channel width pads to this
_BATCH_TILE = 1024            # max batch tile (multiple of 8)


def _round_up(n, m):
    return ((n + m - 1) // m) * m


# ----------------------------------------------------------------------------
# parameter construction (synthetic, deterministic) in the PyTorch layout
# ----------------------------------------------------------------------------
def _linear_shapes(cfg):
    """(din, dout) of every linear_with_channels, in forward order."""
    P = cfg['num_cosmo_params'] + cfg['num_bias_params']
    dims = cfg['mlp_dims']
    out_dim = cfg['output_kbins'] * 2
    shapes = [(P, dims[0])]                              # h1
    for i in range(cfg['num_mlp_blocks']):
        d_in, d_out = dims[i], dims[i + 1]
        for _ in range(cfg['num_block_layers']):
            shapes.append((d_in, d_in))                  # block inner layers
        shapes.append((d_in, d_out))                     # block output layer
        if cfg['use_skip_connection']:
            shapes.append((d_in, d_out))                 # block skip projection
    shapes.append((dims[-1], out_dim))                   # h2
    return shapes


def build_params(key, cfg):
    """Deterministic synthetic per-channel parameters (no checkpoint load)."""
    C = cfg['num_zbins']
    params = []
    for li, (din, dout) in enumerate(_linear_shapes(cfg)):
        kw, kb = jax.random.split(jax.random.fold_in(key, li))
        scale = (2.0 / (din + dout)) ** 0.5
        W = scale * jax.random.normal(kw, (C, din, dout), jnp.float32)
        b = 0.01 * jax.random.normal(kb, (C, 1, dout), jnp.float32)
        params += [W, b]
    return params


# ----------------------------------------------------------------------------
# offline weight packing: block-diag channels, 128-lane pad, norm fold,
# skip fusion, single weight slab + single bias slab
# ----------------------------------------------------------------------------
def _block_diag(W):
    """(C, din, dout) per-channel weights -> (C*din, C*dout) block-diagonal."""
    C, din, dout = W.shape
    eye = jnp.eye(C, dtype=W.dtype)
    return jnp.einsum('cij,cd->cidj', W, eye).reshape(C * din, C * dout)


def pack_params(bounds, params, cfg):
    """Pack per-channel weights into one (rows, 128) slab + one (8, 128) bias slab.

    Returns (w_slab, b_slab, k0, wpad):
      w_slab : all layers' block-diagonal weights stacked along rows, columns
               zero-padded to 128, rows zero-padded so every layer starts at a
               multiple of 8 and every intermediate K equals 128 (256 fused).
      b_slab : one bias row per layer, zero-padded to 128 columns and 8 rows.
      k0     : (padded) input width = round_up(C * num_params, 8).
      wpad   : 128.
    Layer-0 has the min-max normalization folded in; each resnet block's
    output layer + skip projection are fused (concat along K, summed bias).
    """
    C = cfg['num_zbins']
    lo, hi = bounds[:, 0], bounds[:, 1]
    inv = 1.0 / (hi - lo)

    wpad = _LANE
    for (din, dout) in _linear_shapes(cfg):
        assert C * din <= wpad and C * dout <= wpad, "packed width exceeds one lane tile"

    it = iter(params)

    def take():
        W = next(it)                 # (C, din, dout)
        b = next(it)[:, 0, :]        # (C, dout)
        return W, b

    def pad_cols(a):
        return jnp.pad(a, ((0, 0), (0, wpad - a.shape[1])))

    def pad_rows(a, rows):
        return jnp.pad(a, ((0, rows - a.shape[0]), (0, 0)))

    Ws, bs = [], []

    # h1 with normalization folded in:
    #   (x - lo)*inv @ W + b  ==  x @ (inv[:,None]*W) + (b - (lo*inv) @ W)
    W, b = take()
    Wn = W * inv[None, :, None]
    bn = b - jnp.einsum('p,cpd->cd', lo * inv, W)
    W0 = _block_diag(Wn)
    k0 = _round_up(W0.shape[0], 8)
    Ws.append(pad_rows(pad_cols(W0), k0))
    bs.append(pad_cols(bn.reshape(1, -1)))

    for _ in range(cfg['num_mlp_blocks']):
        for _ in range(cfg['num_block_layers']):
            W, b = take()
            Ws.append(pad_rows(pad_cols(_block_diag(W)), wpad))
            bs.append(pad_cols(b.reshape(1, -1)))
        Wo, bo = take()                                  # block output layer
        if cfg['use_skip_connection']:
            Wsk, bsk = take()                            # skip projection
            Wf = jnp.concatenate(
                [pad_rows(pad_cols(_block_diag(Wo)), wpad),
                 pad_rows(pad_cols(_block_diag(Wsk)), wpad)], axis=0)
            Ws.append(Wf)
            bs.append(pad_cols((bo + bsk).reshape(1, -1)))
        else:
            Ws.append(pad_rows(pad_cols(_block_diag(Wo)), wpad))
            bs.append(pad_cols(bo.reshape(1, -1)))

    W, b = take()                                        # h2
    Ws.append(pad_rows(pad_cols(_block_diag(W)), wpad))
    bs.append(pad_cols(b.reshape(1, -1)))

    w_slab = jnp.concatenate(Ws, axis=0)                 # (total_rows, 128)
    b_slab = jnp.concatenate(bs, axis=0)                 # (n_layers, 128)
    n_layers = b_slab.shape[0]
    b_slab = jnp.pad(b_slab, ((0, _round_up(n_layers, 8) - n_layers), (0, 0)))
    return w_slab, b_slab, k0, wpad


# ----------------------------------------------------------------------------
# kernel: one batch tile, all zbins at once (packed, 128-lane-dense layout)
# ----------------------------------------------------------------------------
def _mlp_kernel(k0, wpad, num_mlp_blocks, num_block_layers, use_skip,
                x_ref, w_ref, b_ref, out_ref):
    # Static walk over the single weight/bias slabs: all row offsets are
    # multiples of 8, all widths are 128 -> tile-aligned, copy-free slices.
    off = [0]
    li = [0]

    def lin(h, k_rows):
        W = w_ref[off[0]:off[0] + k_rows, :]     # (k_rows, 128)
        b = b_ref[li[0]:li[0] + 1, :]            # (1, 128)
        off[0] += k_rows
        li[0] += 1
        return jnp.dot(h, W, preferred_element_type=jnp.float32) + b

    h = jax.nn.relu(lin(x_ref[...], k0))         # relu(h1(X)), norm pre-folded
    for _ in range(num_mlp_blocks):
        y = h
        for _ in range(num_block_layers):
            y = jax.nn.relu(lin(y, wpad))
        if use_skip:
            # fused block-output + skip-projection matmul; concat boundary
            # falls exactly on lane 128 (tile-aligned)
            y = lin(jnp.concatenate([y, h], axis=-1), 2 * wpad)
        else:
            y = lin(y, wpad)
        h = jax.nn.relu(y)
    out_ref[...] = jax.nn.sigmoid(lin(h, wpad)).astype(out_ref.dtype)   # sigmoid(h2)


# ----------------------------------------------------------------------------
# wrapper
# ----------------------------------------------------------------------------
def mlp_forward(x_bczp, bounds, params, cfg):
    """x_bczp: (batch, num_zbins, num_samples=1, num_params) — PyTorch layout."""
    B, C, S, P = x_bczp.shape
    assert S == 1, "packed channel layout assumes num_samples == 1"
    out_dim = cfg['output_kbins'] * 2

    w_slab, b_slab, k0, wpad = pack_params(bounds, params, cfg)

    # flatten(1,2) + channel-packed lane layout: (B, C*P), channel-major
    x_flat = x_bczp.reshape(B, C * S * P)
    if k0 != C * S * P:
        x_flat = jnp.pad(x_flat, ((0, 0), (0, k0 - C * S * P)))

    # Batch tiling: no batch padding (Pallas masks the ragged last block).
    # For moderate/large batches use >=2 grid steps so a 2-TC chip (v7x) can
    # shard the "parallel" axis; cap the tile at _BATCH_TILE rows.
    if B <= 8:
        TB = B                                   # single step, block == full dim
    else:
        TB = min(_BATCH_TILE, _round_up(pl.cdiv(B, 2), 8))
    n_steps = pl.cdiv(B, TB)

    kernel = functools.partial(
        _mlp_kernel, k0, wpad,
        cfg['num_mlp_blocks'], cfg['num_block_layers'], cfg['use_skip_connection'])

    out = pl.pallas_call(
        kernel,
        out_shape=jax.ShapeDtypeStruct((B, wpad), jnp.float32),
        grid_spec=pltpu.PrefetchScalarGridSpec(
            num_scalar_prefetch=0,
            grid=(n_steps,),
            in_specs=[
                pl.BlockSpec((TB, k0), lambda i: (i, 0)),            # x tile
                pl.BlockSpec(w_slab.shape, lambda i: (0, 0)),        # resident W slab
                pl.BlockSpec(b_slab.shape, lambda i: (0, 0)),        # resident bias slab
            ],
            out_specs=pl.BlockSpec((TB, wpad), lambda i: (i, 0)),    # lane-dense slab
        ),
        compiler_params=pltpu.CompilerParams(
            dimension_semantics=("parallel",)),
    )(x_flat, w_slab, b_slab)

    # drop the zero-padded lanes, restore (batch, num_zbins, output_dim)
    return out[:, :C * out_dim].reshape(B, C, out_dim)


# ----------------------------------------------------------------------------
# pure-JAX reference mirroring the original PyTorch forward semantics
# ----------------------------------------------------------------------------
def mlp_reference(x_bczp, bounds, params, cfg):
    B, C, S, P = x_bczp.shape
    lo, hi = bounds[:, 0], bounds[:, 1]
    x = (x_bczp - lo) / (hi - lo)                # normalize
    x = x.reshape(B, C * S, P)                   # flatten(1, 2)

    it = iter(params)

    def lin(h):
        W = next(it)                             # (C, din, dout)
        b = next(it)                             # (C, 1, dout)
        return jnp.einsum('bcd,cde->bce', h, W) + b[:, 0, :]

    h = jax.nn.relu(lin(x))
    for _ in range(cfg['num_mlp_blocks']):
        y = h
        for _ in range(cfg['num_block_layers']):
            y = jax.nn.relu(lin(y))
        y = lin(y)
        if cfg['use_skip_connection']:
            y = y + lin(h)
        h = jax.nn.relu(y)
    return jax.nn.sigmoid(lin(h))


if __name__ == "__main__":
    cfg = CONFIG
    key = jax.random.PRNGKey(0)
    kx, kp = jax.random.split(key)

    B = 2
    C = cfg['num_zbins']
    P = cfg['num_cosmo_params'] + cfg['num_bias_params']

    # bounds buffer: (num_params, 2), col 0 = lower, col 1 = upper
    bounds = jnp.stack(
        [jnp.linspace(-1.0, 0.0, P), jnp.linspace(1.0, 2.0, P)], axis=1
    ).astype(jnp.float32)

    # X in the module's input layout (batch, num_zbins, num_samples=1, num_params)
    x = jax.random.uniform(kx, (B, C, 1, P), jnp.float32, minval=-0.5, maxval=1.5)
    params = build_params(kp, cfg)

    out = jax.block_until_ready(mlp_forward(x, bounds, params, cfg))

    ref = mlp_reference(x, bounds, params, cfg)
    assert out.shape == (B, C, cfg['output_kbins'] * 2)
    assert jnp.allclose(out, ref, atol=1e-5, rtol=1e-5)
    print("KERNEL_OK")
</pallas_src>

<mosaic_0001>
module attributes {stable_mosaic.version = 11 : i64} {
  func.func @_mlp_kernel(%arg0: i32, %arg1: memref<2x24xf32, #tpu.memory_space<vmem>>, %arg2: memref<1176x128xf32, #tpu.memory_space<vmem>>, %arg3: memref<8x128xf32, #tpu.memory_space<vmem>>, %arg4: memref<2x128xf32, #tpu.memory_space<vmem>>) attributes {dimension_semantics = [#tpu.dimension_semantics<parallel>], iteration_bounds = array<i64: 1>, scalar_prefetch = 0 : i64, scratch_operands = 0 : i64, tpu.core_type = #tpu.core_type<tc>, window_params = [{transform_indices = @transform_0, window_bounds = array<i64: 2, 24>}, {pipeline_mode = #tpu.pipeline_mode<synchronous>, transform_indices = @transform_1, window_bounds = array<i64: 1176, 128>}, {pipeline_mode = #tpu.pipeline_mode<synchronous>, transform_indices = @transform_2, window_bounds = array<i64: 8, 128>}, {transform_indices = @transform_3, window_bounds = array<i64: 2, 128>}]} {
    %c0 = arith.constant 0 : index
    %c0_0 = arith.constant 0 : index
    %0 = vector.load %arg1[%c0, %c0_0] : memref<2x24xf32, #tpu.memory_space<vmem>>, vector<2x24xf32>
    %c0_1 = arith.constant 0 : index
    %c0_2 = arith.constant 0 : index
    %1 = vector.load %arg2[%c0_1, %c0_2] : memref<1176x128xf32, #tpu.memory_space<vmem>>, vector<24x128xf32>
    %c0_3 = arith.constant 0 : index
    %c0_4 = arith.constant 0 : index
    %2 = vector.load %arg3[%c0_3, %c0_4] : memref<8x128xf32, #tpu.memory_space<vmem>>, vector<1x128xf32>
    %cst = arith.constant dense<0.000000e+00> : vector<2x128xf32>
    %3 = tpu.matmul %0, %1, %cst {dimension_numbers = #tpu.dot_dimension_numbers<[1], [0], [0], [1], [0, 0, 1, 1], [], []>} : vector<2x24xf32>, vector<24x128xf32>, vector<2x128xf32> -> vector<2x128xf32>
    %4 = vector.broadcast %2 : vector<1x128xf32> to vector<2x128xf32>
    %5 = arith.addf %3, %4 : vector<2x128xf32>
    %cst_5 = arith.constant 0.000000e+00 : f32
    %6 = vector.broadcast %cst_5 : f32 to vector<2x128xf32>
    %7 = arith.maximumf %5, %6 : vector<2x128xf32>
    %c24 = arith.constant 24 : index
    %c0_6 = arith.constant 0 : index
    %8 = vector.load %arg2[%c24, %c0_6] : memref<1176x128xf32, #tpu.memory_space<vmem>>, vector<128x128xf32>
    %c1 = arith.constant 1 : index
    %c0_7 = arith.constant 0 : index
    %9 = vector.load %arg3[%c1, %c0_7] : memref<8x128xf32, #tpu.memory_space<vmem>>, vector<1x128xf32>
    %cst_8 = arith.constant dense<0.000000e+00> : vector<2x128xf32>
    %10 = tpu.matmul %7, %8, %cst_8 {dimension_numbers = #tpu.dot_dimension_numbers<[1], [0], [0], [1], [0, 0, 1, 1], [], []>} : vector<2x128xf32>, vector<128x128xf32>, vector<2x128xf32> -> vector<2x128xf32>
    %11 = vector.broadcast %9 : vector<1x128xf32> to vector<2x128xf32>
    %12 = arith.addf %10, %11 : vector<2x128xf32>
    %cst_9 = arith.constant 0.000000e+00 : f32
    %13 = vector.broadcast %cst_9 : f32 to vector<2x128xf32>
    %14 = arith.maximumf %12, %13 : vector<2x128xf32>
    %c152 = arith.constant 152 : index
    %c0_10 = arith.constant 0 : index
    %15 = vector.load %arg2[%c152, %c0_10] : memref<1176x128xf32, #tpu.memory_space<vmem>>, vector<128x128xf32>
    %c2 = arith.constant 2 : index
    %c0_11 = arith.constant 0 : index
    %16 = vector.load %arg3[%c2, %c0_11] : memref<8x128xf32, #tpu.memory_space<vmem>>, vector<1x128xf32>
    %cst_12 = arith.constant dense<0.000000e+00> : vector<2x128xf32>
    %17 = tpu.matmul %14, %15, %cst_12 {dimension_numbers = #tpu.dot_dimension_numbers<[1], [0], [0], [1], [0, 0, 1, 1], [], []>} : vector<2x128xf32>, vector<128x128xf32>, vector<2x128xf32> -> vector<2x128xf32>
    %18 = vector.broadcast %16 : vector<1x128xf32> to vector<2x128xf32>
    %19 = arith.addf %17, %18 : vector<2x128xf32>
    %cst_13 = arith.constant 0.000000e+00 : f32
    %20 = vector.broadcast %cst_13 : f32 to vector<2x128xf32>
    %21 = arith.maximumf %19, %20 : vector<2x128xf32>
    %22 = tpu.concatenate %21, %7 in 1 : vector<2x128xf32>, vector<2x128xf32> -> vector<2x256xf32>
    %c280 = arith.constant 280 : index
    %c0_14 = arith.constant 0 : index
    %23 = vector.load %arg2[%c280, %c0_14] : memref<1176x128xf32, #tpu.memory_space<vmem>>, vector<256x128xf32>
    %c3 = arith.constant 3 : index
    %c0_15 = arith.constant 0 : index
    %24 = vector.load %arg3[%c3, %c0_15] : memref<8x128xf32, #tpu.memory_space<vmem>>, vector<1x128xf32>
    %cst_16 = arith.constant dense<0.000000e+00> : vector<2x128xf32>
    %25 = tpu.matmul %22, %23, %cst_16 {dimension_numbers = #tpu.dot_dimension_numbers<[1], [0], [0], [1], [0, 0, 1, 1], [], []>} : vector<2x256xf32>, vector<256x128xf32>, vector<2x128xf32> -> vector<2x128xf32>
    %26 = vector.broadcast %24 : vector<1x128xf32> to vector<2x128xf32>
    %27 = arith.addf %25, %26 : vector<2x128xf32>
    %cst_17 = arith.constant 0.000000e+00 : f32
    %28 = vector.broadcast %cst_17 : f32 to vector<2x128xf32>
    %29 = arith.maximumf %27, %28 : vector<2x128xf32>
    %c536 = arith.constant 536 : index
    %c0_18 = arith.constant 0 : index
    %30 = vector.load %arg2[%c536, %c0_18] : memref<1176x128xf32, #tpu.memory_space<vmem>>, vector<128x128xf32>
    %c4 = arith.constant 4 : index
    %c0_19 = arith.constant 0 : index
    %31 = vector.load %arg3[%c4, %c0_19] : memref<8x128xf32, #tpu.memory_space<vmem>>, vector<1x128xf32>
    %cst_20 = arith.constant dense<0.000000e+00> : vector<2x128xf32>
    %32 = tpu.matmul %29, %30, %cst_20 {dimension_numbers = #tpu.dot_dimension_numbers<[1], [0], [0], [1], [0, 0, 1, 1], [], []>} : vector<2x128xf32>, vector<128x128xf32>, vector<2x128xf32> -> vector<2x128xf32>
    %33 = vector.broadcast %31 : vector<1x128xf32> to vector<2x128xf32>
    %34 = arith.addf %32, %33 : vector<2x128xf32>
    %cst_21 = arith.constant 0.000000e+00 : f32
    %35 = vector.broadcast %cst_21 : f32 to vector<2x128xf32>
    %36 = arith.maximumf %34, %35 : vector<2x128xf32>
    %c664 = arith.constant 664 : index
    %c0_22 = arith.constant 0 : index
    %37 = vector.load %arg2[%c664, %c0_22] : memref<1176x128xf32, #tpu.memory_space<vmem>>, vector<128x128xf32>
    %c5 = arith.constant 5 : index
    %c0_23 = arith.constant 0 : index
    %38 = vector.load %arg3[%c5, %c0_23] : memref<8x128xf32, #tpu.memory_space<vmem>>, vector<1x128xf32>
    %cst_24 = arith.constant dense<0.000000e+00> : vector<2x128xf32>
    %39 = tpu.matmul %36, %37, %cst_24 {dimension_numbers = #tpu.dot_dimension_numbers<[1], [0], [0], [1], [0, 0, 1, 1], [], []>} : vector<2x128xf32>, vector<128x128xf32>, vector<2x128xf32> -> vector<2x128xf32>
    %40 = vector.broadcast %38 : vector<1x128xf32> to vector<2x128xf32>
    %41 = arith.addf %39, %40 : vector<2x128xf32>
    %cst_25 = arith.constant 0.000000e+00 : f32
    %42 = vector.broadcast %cst_25 : f32 to vector<2x128xf32>
    %43 = arith.maximumf %41, %42 : vector<2x128xf32>
    %44 = tpu.concatenate %43, %29 in 1 : vector<2x128xf32>, vector<2x128xf32> -> vector<2x256xf32>
    %c792 = arith.constant 792 : index
    %c0_26 = arith.constant 0 : index
    %45 = vector.load %arg2[%c792, %c0_26] : memref<1176x128xf32, #tpu.memory_space<vmem>>, vector<256x128xf32>
    %c6 = arith.constant 6 : index
    %c0_27 = arith.constant 0 : index
    %46 = vector.load %arg3[%c6, %c0_27] : memref<8x128xf32, #tpu.memory_space<vmem>>, vector<1x128xf32>
    %cst_28 = arith.constant dense<0.000000e+00> : vector<2x128xf32>
    %47 = tpu.matmul %44, %45, %cst_28 {dimension_numbers = #tpu.dot_dimension_numbers<[1], [0], [0], [1], [0, 0, 1, 1], [], []>} : vector<2x256xf32>, vector<256x128xf32>, vector<2x128xf32> -> vector<2x128xf32>
    %48 = vector.broadcast %46 : vector<1x128xf32> to vector<2x128xf32>
    %49 = arith.addf %47, %48 : vector<2x128xf32>
    %cst_29 = arith.constant 0.000000e+00 : f32
    %50 = vector.broadcast %cst_29 : f32 to vector<2x128xf32>
    %51 = arith.maximumf %49, %50 : vector<2x128xf32>
    %c1048 = arith.constant 1048 : index
    %c0_30 = arith.constant 0 : index
    %52 = vector.load %arg2[%c1048, %c0_30] : memref<1176x128xf32, #tpu.memory_space<vmem>>, vector<128x128xf32>
    %c7 = arith.constant 7 : index
    %c0_31 = arith.constant 0 : index
    %53 = vector.load %arg3[%c7, %c0_31] : memref<8x128xf32, #tpu.memory_space<vmem>>, vector<1x128xf32>
    %cst_32 = arith.constant dense<0.000000e+00> : vector<2x128xf32>
    %54 = tpu.matmul %51, %52, %cst_32 {dimension_numbers = #tpu.dot_dimension_numbers<[1], [0], [0], [1], [0, 0, 1, 1], [], []>} : vector<2x128xf32>, vector<128x128xf32>, vector<2x128xf32> -> vector<2x128xf32>
    %55 = vector.broadcast %53 : vector<1x128xf32> to vector<2x128xf32>
    %56 = arith.addf %54, %55 : vector<2x128xf32>
    %57 = arith.negf %56 : vector<2x128xf32>
    %58 = math.exp %57 : vector<2x128xf32>
    %cst_33 = arith.constant 1.000000e+00 : f32
    %59 = vector.broadcast %cst_33 : f32 to vector<2x128xf32>
    %60 = arith.addf %59, %58 : vector<2x128xf32>
    %61 = arith.divf %59, %60 : vector<2x128xf32>
    %c0_34 = arith.constant 0 : index
    %c0_35 = arith.constant 0 : index
    %62 = vector.load %arg4[%c0_34, %c0_35] : memref<2x128xf32, #tpu.memory_space<vmem>>, vector<2x128xf32>
    tpu.vector_store %arg4[%c0_34, %c0_35], %61 {strides = array<i32>} : memref<2x128xf32, #tpu.memory_space<vmem>>, vector<2x128xf32>,
    return
  }
  func.func @transform_0(%arg0: i32) -> (i32, i32) {
    %c0_i32 = arith.constant 0 : i32
    %c0_i32_0 = arith.constant 0 : i32
    return %arg0, %c0_i32 : i32, i32
  }
  func.func @transform_1(%arg0: i32) -> (i32, i32) {
    %c0_i32 = arith.constant 0 : i32
    %c0_i32_0 = arith.constant 0 : i32
    %c0_i32_1 = arith.constant 0 : i32
    return %c0_i32, %c0_i32_0 : i32, i32
  }
  func.func @transform_2(%arg0: i32) -> (i32, i32) {
    %c0_i32 = arith.constant 0 : i32
    %c0_i32_0 = arith.constant 0 : i32
    %c0_i32_1 = arith.constant 0 : i32
    return %c0_i32, %c0_i32_0 : i32, i32
  }
  func.func @transform_3(%arg0: i32) -> (i32, i32) {
    %c0_i32 = arith.constant 0 : i32
    %c0_i32_0 = arith.constant 0 : i32
    return %arg0, %c0_i32 : i32, i32
  }
}

</mosaic_0001>

<bundles_post_ra>
// kernel: tpu_custom_call.1
= control target key start
LH: loop header
LB: loop body
LE: loop exit
PB: predicated region body
PF: predicated region fallthrough
CT: control target
= control target key end

     0   :  { %8 = vsyncpa [#allocation3], 0  ;;  %s1612_s0 = inlined_call_operand.hbm [shape: f32[2,24], index: 0, kind: input, shape index: {}]   ;;  %s1613_s1 = inlined_call_operand.hbm [shape: f32[1176,128], index: 1, kind: input, shape index: {}]   ;;  %s1614_s2 = inlined_call_operand.hbm [shape: f32[8,128], index: 2, kind: input, shape index: {}]   ;;  %s1615_s3 = inlined_call_operand.hbm [shape: f32[2,128], index: 3, kind: output, shape index: {}]  }
   0x1   :  { %9 = vsyncpa [#allocation6], 0 }
   0x2   :  { %10 = vsyncpa [#allocation4], 0  ;;  %s1481_s12 = smov [#allocation5]   ;;  %s1387_s16 = scalar_lea.hbm %s1613_s1, 18816 }
   0x3   :  { %s26_s13 = sshll.u32 %s1481_s12, 4  ;;  %p1388_p0 = scmp.ne.s32.totalorder %s1613_s1, %s1387_s16  ;;  %s27_s13 = int_to_ptr.vmem [resolvable:$true] %s26_s13 }
   0x4   :  { %p1391_p1 = scmp.lt.u32.totalorder %s1387_s16, %s1613_s1 }
   0x6   :  { %p1393_p2 = pnand %p1391_p1, %p1388_p0 }
   0x8   :  { %1396 = shalt.err (!%p1393_p2)
}
   0x9   :  { %s1397_s21 = scalar_lea.vmem %s27_s13, 18816  ;;  %p1402_p4 = scmp.lt.s32.totalorder %s27_s13, %s27_s13 }
   0xa   :  { %p1398_p3 = scmp.ne.s32.totalorder %s27_s13, %s1397_s21  ;;  %p1403_p5 = scmp.lt.s32.totalorder %s1397_s21, %s1397_s21 }
   0xc   :  { %p1404_p6 = por %p1403_p5, %p1402_p4 }
   0xe   :  { %p1405_p7 = pnand %p1404_p6, %p1398_p3 }
  0x10   :  { %1408 = shalt.err (!%p1405_p7)
}
  0x11   :  { %s1482_s22 = smov 128   ;;  %s1483_s23 = smov 8  }
  0x12   :  { %32 = dma.hbm_to_vmem [thread:$0]  %s1613_s1, 18816, %s27_s13, [#allocation6], %s1482_s22, %s1482_s22, %s1483_s23  }
  0x13   :  { %s1484_s26 = smov [#allocation2]   ;;  %s1485_s28 = smov [#allocation7]  }
  0x14   :  { %s17_s27 = sshll.u32 %s1484_s26, 4  ;;  %s39_s29 = sshll.u32 %s1485_s28, 4  ;;  %s18_s27 = int_to_ptr.vmem [resolvable:$true] %s17_s27  ;;  %s40_s29 = int_to_ptr.vmem [resolvable:$true] %s39_s29 }
  0x15   :  { %s1409_s5 = scalar_lea.hbm %s1612_s0, 32 }
  0x16   :  { %p1410_p8 = scmp.ne.s32.totalorder %s1612_s0, %s1409_s5  ;;  %p1413_p9 = scmp.lt.u32.totalorder %s1409_s5, %s1612_s0 }
  0x18   :  { %p1415_p10 = pnand %p1413_p9, %p1410_p8 }
  0x1a   :  { %1418 = shalt.err (!%p1415_p10)
}
  0x1b   :  { %s1419_s1 = scalar_lea.vmem %s18_s27, 32  ;;  %p1424_p12 = scmp.lt.s32.totalorder %s18_s27, %s18_s27 }
  0x1c   :  { %p1420_p11 = scmp.ne.s32.totalorder %s18_s27, %s1419_s1  ;;  %p1425_p13 = scmp.lt.s32.totalorder %s1419_s1, %s1419_s1 }
  0x1e   :  { %p1426_p0 = por %p1425_p13, %p1424_p12 }
  0x20   :  { %p1427_p1 = pnand %p1426_p0, %p1420_p11 }
  0x22   :  { %1430 = shalt.err (!%p1427_p1)
}
  0x23   :  { %20 = dma.hbm_to_vmem [thread:$0]  %s1612_s0, 32, %s18_s27, [#allocation3]  }
  0x24   :  { %s1431_s14 = scalar_lea.hbm %s1614_s2, 128 }
  0x25   :  { %p1432_p2 = scmp.ne.s32.totalorder %s1614_s2, %s1431_s14  ;;  %p1435_p3 = scmp.lt.u32.totalorder %s1431_s14, %s1614_s2 }
  0x27   :  { %p1437_p4 = pnand %p1435_p3, %p1432_p2 }
  0x29   :  { %1440 = shalt.err (!%p1437_p4)
}
  0x2a   :  { %s1441_s19 = scalar_lea.vmem %s40_s29, 128  ;;  %p1446_p6 = scmp.lt.s32.totalorder %s40_s29, %s40_s29 }
  0x2b   :  { %p1442_p5 = scmp.ne.s32.totalorder %s40_s29, %s1441_s19  ;;  %p1447_p7 = scmp.lt.s32.totalorder %s1441_s19, %s1441_s19 }
  0x2d   :  { %p1448_p8 = por %p1447_p7, %p1446_p6 }
  0x2f   :  { %p1449_p9 = pnand %p1448_p8, %p1442_p5 }
  0x31   :  { %1452 = shalt.err (!%p1449_p9)
}
  0x32   :  { %42 = dma.hbm_to_vmem [thread:$0]  %s1614_s2, 128, %s40_s29, [#allocation6]  }
  0x33   :  { %1475 = dma.done.wait [#allocation3], 32  }
  0x34   :  { %1476 = vsyncadd [#allocation3], 4294967264 }
  0x35   :  { %1477 = dma.done.wait [#allocation6], 18944  }
  0x36   :  { %1478 = vsyncadd [#allocation6], 4294948352  ;;  %v1486_v0 = vmov 0.0|0.0   ;;  %vm1487_vm0 = vmmov 0   ;;  %v1488_v1 = vmov 0.0   ;;  %v53_v2 = vld [vmem:[#allocation5] sm:$0xff] }
  0x37   :  { %1187 = vmatprep.subr.bf16.mxu0 %v1486_v0  ;;  %1009 = vmatprep.mubr.msk.f32.mxu0 %vm1487_vm0, %v1488_v1  ;;  %v54_v3 = vld [vmem:[#allocation5 + $0x8] sm:$0xff]  ;;  %v136_v5 = vld [vmem:[#allocation5 + $0x18] sm:$0xff]  ;;  %v137_v6 = vld [vmem:[#allocation5 + $0x20] sm:$0xff]  ;;  %vm61_vm1 = vcmask 195584   ;;  %s1489_s2 = smov [#allocation8]  }
  0x38   :  { %1190 = vmatprep.subr.bf16.mxu1 %v1486_v0  ;;  %1044 = vmatprep.mubr.msk.f32.mxu1 %vm1487_vm0, %v1488_v1  ;;  %v1188_v4 = vpack.c.bf16 %v54_v3, %v53_v2  ;;  %v1191_v7 = vpack.c.bf16 %v137_v6, %v136_v5  ;;  %v138_v8 = vld [vmem:[#allocation5 + $0x28] sm:$0xff]  ;;  %v139_v9 = vld [vmem:[#allocation5 + $0x30] sm:$0xff]  ;;  %v52_v12 = vld [vmem:[#allocation2] sm:$0x3]  ;;  %s824_s21 = sshll.u32 %s1489_s2, 4  ;;  %s825_s21 = int_to_ptr.vmem [resolvable:$true] %s824_s21 }
  0x39   :  { %v55_v10 = vld [vmem:[#allocation5 + $0x10] sm:$0xff]  ;;  %v1194_v11 = vpack.c.bf16 %v139_v9, %v138_v8  ;;  %v140_v13 = vld [vmem:[#allocation5 + $0x38] sm:$0xff]  ;;  %v141_v14 = vld [vmem:[#allocation5 + $0x40] sm:$0xff]  ;;  %s1453_s22 = scalar_lea.vmem %s825_s21, 32  ;;  %p1458_p11 = scmp.lt.s32.totalorder %s825_s21, %s825_s21 }
  0x3a   :  { %1189 = vmatpush3.bf16.msra.mxu0 %v1188_v4  ;;  %1192 = vmatpush3.bf16.msra.mxu1 %v1191_v7  ;;  %v1197_v15 = vpack.c.bf16 %v141_v14, %v140_v13  ;;  %v142_v16 = vld [vmem:[#allocation5 + $0x48] sm:$0xff]  ;;  %v143_v17 = vld [vmem:[#allocation5 + $0x50] sm:$0xff]  ;;  %v144_v19 = vld [vmem:[#allocation5 + $0x58] sm:$0xff]  ;;  %p1454_p10 = scmp.ne.s32.totalorder %s825_s21, %s1453_s22  ;;  %p1459_p12 = scmp.lt.s32.totalorder %s1453_s22, %s1453_s22 }
  0x3b   :  { %1007 = vmatprep.subr.mxu0 %v1488_v1  ;;  %1193 = vmatprep.subr.bf16.mxu1 %v1486_v0  ;;  %v1200_v18 = vpack.c.bf16 %v143_v17, %v142_v16  ;;  %v145_v20 = vld [vmem:[#allocation5 + $0x60] sm:$0xff]  ;;  %v146_v22 = vld [vmem:[#allocation5 + $0x68] sm:$0xff]  ;;  %v147_v23 = vld [vmem:[#allocation5 + $0x70] sm:$0xff] }
  0x3c   :  { %v1203_v21 = vpack.c.bf16 %v145_v20, %v144_v19  ;;  %v1206_v24 = vpack.c.bf16 %v147_v23, %v146_v22  ;;  %v148_v25 = vld [vmem:[#allocation5 + $0x78] sm:$0xff]  ;;  %v149_v26 = vld [vmem:[#allocation5 + $0x80] sm:$0xff]  ;;  %v150_v28 = vld [vmem:[#allocation5 + $0x88] sm:$0xff]  ;;  %p1460_p13 = por %p1459_p12, %p1458_p11 }
  0x3d   :  { %v1209_v27 = vpack.c.bf16 %v149_v26, %v148_v25  ;;  %v151_v29 = vld [vmem:[#allocation5 + $0x90] sm:$0xff]  ;;  %v228_v31 = vld [vmem:[#allocation5 + $0x98] sm:$0xff]  ;;  %v229_v32 = vld [vmem:[#allocation5 + $0xa0] sm:$0xff] }
  0x3e   :  { %1008 = vmatpush3.msra.mxu0 %v55_v10  ;;  %1195 = vmatpush3.bf16.msra.mxu1 %v1194_v11  ;;  %v1212_v30 = vpack.c.bf16 %v151_v29, %v150_v28  ;;  %v230_v33 = vld [vmem:[#allocation5 + $0xa8] sm:$0xff]  ;;  %v1215_v34 = vpack.c.bf16 %v229_v32, %v228_v31  ;;  %v231_v35 = vld [vmem:[#allocation5 + $0xb0] sm:$0xff]  ;;  %v232_v37 = vld [vmem:[#allocation5 + $0xb8] sm:$0xff]  ;;  %p1461_p0 = pnand %p1460_p13, %p1454_p10 }
  0x3f   :  { %1010 = vmatmul.mubr.msk.f32.vlgmr.msra.gmra.mrb[0].mxu0 %vm61_vm1, %v52_v12  ;;  %1196 = vmatprep.subr.bf16.mxu1 %v1486_v0  ;;  %v1218_v36 = vpack.c.bf16 %v231_v35, %v230_v33  ;;  %v233_v38 = vld [vmem:[#allocation5 + $0xc0] sm:$0xff]  ;;  %v234_v40 = vld [vmem:[#allocation5 + $0xc8] sm:$0xff]  ;;  %v235_v41 = vld [vmem:[#allocation5 + $0xd0] sm:$0xff] }
  0x40   :  { %1214 = vmatprep.subr.bf16.mxu0 %v1486_v0  ;;  %1079 = vmatprep.mubr.msk.f32.mxu0 %vm1487_vm0, %v1488_v1  ;;  %v1221_v39 = vpack.c.bf16 %v233_v38, %v232_v37  ;;  %v1224_v42 = vpack.c.bf16 %v235_v41, %v234_v40  ;;  %v236_v43 = vld [vmem:[#allocation5 + $0xd8] sm:$0xff]  ;;  %v237_v44 = vld [vmem:[#allocation5 + $0xe0] sm:$0xff]  ;;  %v238_v46 = vld [vmem:[#allocation5 + $0xe8] sm:$0xff] }
  0x41   :  { %1216 = vmatpush3.bf16.msra.mxu0 %v1215_v34  ;;  %v1227_v45 = vpack.c.bf16 %v237_v44, %v236_v43  ;;  %v239_v47 = vld [vmem:[#allocation5 + $0xf0] sm:$0xff]  ;;  %v240_v49 = vld [vmem:[#allocation5 + $0xf8] sm:$0xff]  ;;  %v241_v50 = vld [vmem:[#allocation5 + $0x100] sm:$0xff] }
  0x42   :  { %1198 = vmatpush3.bf16.msra.mxu1 %v1197_v15  ;;  %1217 = vmatprep.subr.bf16.mxu0 %v1486_v0  ;;  %v1230_v48 = vpack.c.bf16 %v239_v47, %v238_v46  ;;  %v1233_v51 = vpack.c.bf16 %v241_v50, %v240_v49  ;;  %v834_v52 = vld [vmem:[#allocation7] ss:$0 sm:$0xff]  ;;  %v242_v57 = vld [vmem:[#allocation5 + $0x108] sm:$0xff]  ;;  %v243_v58 = vld [vmem:[#allocation5 + $0x110] sm:$0xff] }
  0x43   :  { %1199 = vmatprep.subr.bf16.mxu1 %v1486_v0  ;;  %v1236_v59 = vpack.c.bf16 %v243_v58, %v242_v57  ;;  %v336_v60 = vld [vmem:[#allocation5 + $0x198] sm:$0xff]  ;;  %v337_v61 = vld [vmem:[#allocation5 + $0x1a0] sm:$0xff]  ;;  %v338_v3 = vld [vmem:[#allocation5 + $0x1a8] sm:$0xff] }
  0x44   :  { %v320_v62 = vld [vmem:[#allocation5 + $0x118] sm:$0xff]  ;;  %v1238_v63 = vpack.c.bf16 %v337_v61, %v336_v60  ;;  %v321_v2 = vld [vmem:[#allocation5 + $0x120] sm:$0xff]  ;;  %v339_v4 = vld [vmem:[#allocation5 + $0x1b0] sm:$0xff] }
  0x45   :  { %1219 = vmatpush3.bf16.msra.mxu0 %v1218_v36  ;;  %v1240_v5 = vpack.c.bf16 %v321_v2, %v320_v62  ;;  %v1242_v6 = vpack.c.bf16 %v339_v4, %v338_v3  ;;  %v322_v7 = vld [vmem:[#allocation5 + $0x128] sm:$0xff]  ;;  %v323_v8 = vld [vmem:[#allocation5 + $0x130] sm:$0xff]  ;;  %v340_v9 = vld [vmem:[#allocation5 + $0x1b8] sm:$0xff] }
  0x46   :  { %1201 = vmatpush3.bf16.msra.mxu1 %v1200_v18  ;;  %1220 = vmatprep.subr.bf16.mxu0 %v1486_v0  ;;  %v341_v10 = vld [vmem:[#allocation5 + $0x1c0] sm:$0xff]  ;;  %v1244_v11 = vpack.c.bf16 %v323_v8, %v322_v7  ;;  %v324_v13 = vld [vmem:[#allocation5 + $0x138] sm:$0xff]  ;;  %v342_v15 = vld [vmem:[#allocation5 + $0x1c8] sm:$0xff] }
  0x47   :  { %1202 = vmatprep.subr.bf16.mxu1 %v1486_v0  ;;  %v1246_v12 = vpack.c.bf16 %v341_v10, %v340_v9  ;;  %v325_v14 = vld [vmem:[#allocation5 + $0x140] sm:$0xff]  ;;  %v343_v16 = vld [vmem:[#allocation5 + $0x1d0] sm:$0xff]  ;;  %v326_v19 = vld [vmem:[#allocation5 + $0x148] sm:$0xff] }
  0x48   :  { %v1248_v17 = vpack.c.bf16 %v325_v14, %v324_v13  ;;  %v1250_v18 = vpack.c.bf16 %v343_v16, %v342_v15  ;;  %v327_v20 = vld [vmem:[#allocation5 + $0x150] sm:$0xff]  ;;  %v345_v22 = vld [vmem:[#allocation5 + $0x1e0] sm:$0xff]  ;;  %v328_v25 = vld [vmem:[#allocation5 + $0x158] sm:$0xff] }
  0x49   :  { %1222 = vmatpush3.bf16.msra.mxu0 %v1221_v39  ;;  %v1252_v23 = vpack.c.bf16 %v327_v20, %v326_v19  ;;  %v329_v26 = vld [vmem:[#allocation5 + $0x160] sm:$0xff]  ;;  %v347_v28 = vld [vmem:[#allocation5 + $0x1f0] sm:$0xff]  ;;  %v330_v31 = vld [vmem:[#allocation5 + $0x168] sm:$0xff] }
  0x4a   :  { %1204 = vmatpush3.bf16.msra.mxu1 %v1203_v21  ;;  %1223 = vmatprep.subr.bf16.mxu0 %v1486_v0  ;;  %v344_v21 = vld [vmem:[#allocation5 + $0x1d8] sm:$0xff]  ;;  %v1256_v29 = vpack.c.bf16 %v329_v26, %v328_v25  ;;  %v331_v32 = vld [vmem:[#allocation5 + $0x170] sm:$0xff]  ;;  %v349_v34 = vld [vmem:[#allocation5 + $0x200] sm:$0xff] }
  0x4b   :  { %1205 = vmatprep.subr.bf16.mxu1 %v1486_v0  ;;  %v348_v33 = vld [vmem:[#allocation5 + $0x1f8] sm:$0xff]  ;;  %v1260_v35 = vpack.c.bf16 %v331_v32, %v330_v31  ;;  %v333_v38 = vld [vmem:[#allocation5 + $0x180] sm:$0xff]  ;;  %v351_v46 = vld [vmem:[#allocation5 + $0x210] sm:$0xff] }
  0x4c   :  { %v1262_v36 = vpack.c.bf16 %v349_v34, %v348_v33  ;;  %v332_v37 = vld [vmem:[#allocation5 + $0x178] sm:$0xff]  ;;  %v335_v49 = vld [vmem:[#allocation5 + $0x190] sm:$0xff]  ;;  %v433_v58 = vld [vmem:[#allocation5 + $0x240] sm:$0xff] }
  0x4d   :  { %1225 = vmatpush3.bf16.msra.mxu0 %v1224_v42  ;;  %v1264_v39 = vpack.c.bf16 %v333_v38, %v332_v37  ;;  %v836_v40 = vld [vmem:[#allocation7 + $0x1] ss:$0 sm:$0xff]  ;;  %v434_v60 = vld [vmem:[#allocation5 + $0x248] sm:$0xff]  ;;  %v435_v61 = vld [vmem:[#allocation5 + $0x250] sm:$0xff] }
  0x4e   :  { %1207 = vmatpush3.bf16.msra.mxu1 %v1206_v24  ;;  %1226 = vmatprep.subr.bf16.mxu0 %v1486_v0  ;;  %v1254_v24 = vpack.c.bf16 %v345_v22, %v344_v21  ;;  %v432_v57 = vld [vmem:[#allocation5 + $0x238] sm:$0xff]  ;;  %v1280_v62 = vpack.c.bf16 %v435_v61, %v434_v60  ;;  %v437_v2 = vld [vmem:[#allocation5 + $0x260] sm:$0xff]  ;;  %v438_v4 = vld [vmem:[#allocation5 + $0x268] sm:$0xff] }
  0x4f   :  { %1208 = vmatprep.subr.bf16.mxu1 %v1486_v0  ;;  %v837_v7 = vld [vmem:[#allocation7 + $0x2] ss:$0 sm:$0xff]  ;;  %v441_v13 = vld [vmem:[#allocation5 + $0x280] sm:$0xff]  ;;  %v442_v15 = vld [vmem:[#allocation5 + $0x288] sm:$0xff] }
  0x50   :  { %v443_v16 = vld [vmem:[#allocation5 + $0x290] sm:$0xff]  ;;  %v521_v19 = vld [vmem:[#allocation5 + $0x2a0] sm:$0xff]  ;;  %v522_v20 = vld [vmem:[#allocation5 + $0x2a8] sm:$0xff] }
  0x51   :  { %1228 = vmatpush3.bf16.msra.mxu0 %v1227_v45  ;;  %v350_v45 = vld [vmem:[#allocation5 + $0x208] sm:$0xff]  ;;  %v523_v22 = vld [vmem:[#allocation5 + $0x2b0] sm:$0xff]  ;;  %v525_v25 = vld [vmem:[#allocation5 + $0x2c0] sm:$0xff] }
  0x52   :  { %1210 = vmatpush3.bf16.msra.mxu1 %v1209_v27  ;;  %1229 = vmatprep.subr.bf16.mxu0 %v1486_v0  ;;  %v346_v27 = vld [vmem:[#allocation5 + $0x1e8] sm:$0xff]  ;;  %v1266_v47 = vpack.c.bf16 %v351_v46, %v350_v45  ;;  %v529_v31 = vld [vmem:[#allocation5 + $0x2e0] sm:$0xff]  ;;  %v531_v34 = vld [vmem:[#allocation5 + $0x2f0] sm:$0xff] }
  0x53   :  { %1211 = vmatprep.subr.bf16.mxu1 %v1486_v0  ;;  %v530_v33 = vld [vmem:[#allocation5 + $0x2e8] sm:$0xff]  ;;  %v533_v37 = vld [vmem:[#allocation5 + $0x300] sm:$0xff]  ;;  %v535_v46 = vld [vmem:[#allocation5 + $0x310] sm:$0xff] }
  0x54   :  { %v534_v45 = vld [vmem:[#allocation5 + $0x308] sm:$0xff]  ;;  %v633_v60 = vld [vmem:[#allocation5 + $0x3c0] sm:$0xff] }
  0x55   :  { %1231 = vmatpush3.bf16.msra.mxu0 %v1230_v48  ;;  %v334_v48 = vld [vmem:[#allocation5 + $0x188] sm:$0xff] }
  0x56   :  { %1213 = vmatpush3.bf16.msra.mxu1 %v1212_v30  ;;  %1232 = vmatprep.subr.bf16.mxu0 %v1486_v0  ;;  %v1258_v30 = vpack.c.bf16 %v347_v28, %v346_v27  ;;  %v1268_v50 = vpack.c.bf16 %v335_v49, %v334_v48  ;;  %v526_v27 = vld [vmem:[#allocation5 + $0x2c8] sm:$0xff]  ;;  %v527_v28 = vld [vmem:[#allocation5 + $0x2d0] sm:$0xff]  ;;  %v628_v48 = vld [vmem:[#allocation5 + $0x398] sm:$0xff] }
  0x57   :  { %1239 = vmatprep.subr.bf16.mxu1 %v1238_v63  ;;  %v436_v63 = vld [vmem:[#allocation5 + $0x258] sm:$0xff]  ;;  %v629_v49 = vld [vmem:[#allocation5 + $0x3a0] sm:$0xff] }
  0x58   :  { %v1283_v3 = vpack.c.bf16 %v437_v2, %v436_v63  ;;  %v616_v63 = vld [vmem:[#allocation5 + $0x338] sm:$0xff]  ;;  %v617_v2 = vld [vmem:[#allocation5 + $0x340] sm:$0xff] }
  0x59   :  { %1234 = vmatpush3.bf16.msra.mxu0 %v1233_v51  ;;  %v428_v51 = vld [vmem:[#allocation5 + $0x218] sm:$0xff] }
  0x5a   :  { %1235 = vmatprep.subr.bf16.mxu0 %v1486_v0 }
  0x5d   :  { %1237 = vmatpush3.bf16.msra.mxu0 %v1236_v59  ;;  %v1277_v59 = vpack.c.bf16 %v433_v58, %v432_v57  ;;  %v614_v57 = vld [vmem:[#allocation5 + $0x328] sm:$0xff]  ;;  %v615_v58 = vld [vmem:[#allocation5 + $0x330] sm:$0xff] }
  0x5e   :  { %1270 = vmatprep.subr.bf16.mxu0 %v1486_v0  ;;  %v1324_v61 = vpack.c.bf16 %v615_v58, %v614_v57 }
 0x112   :  { %v131_v53 = vpop.f32.mrb[0].mxu0 }
 0x113   :  { %v132_v54 = vadd.f32 %v834_v52, %v131_v53  ;;  %v1011_v55 = vpop.f32.mrb[1].mxu0  ;;  %v429_v52 = vld [vmem:[#allocation5 + $0x220] sm:$0xff]  ;;  %v430_v53 = vld [vmem:[#allocation5 + $0x228] sm:$0xff] }
 0x114   :  { %v431_v55 = vld [vmem:[#allocation5 + $0x230] sm:$0xff] }
 0x115   :  { %v135_v56 = vmax.f32 %v132_v54, 0.0  ;;  %v1271_v54 = vpack.c.bf16 %v429_v52, %v428_v51  ;;  %v1318_v51 = vpack.c.bf16 %v629_v49, %v628_v48  ;;  %v613_v52 = vld [vmem:[#allocation5 + $0x320] sm:$0xff]  ;;  %v727_v48 = vld [vmem:[#allocation5 + $0x450] sm:$0xff] }
 0x117   :  { %1045 = vmatmul.mubr.f32.vlgmr.msra.gmra.mrb[0].mxu1 %v135_v56 }
 0x118   :  { %421 = vmatprep.mubr.f32.mxu1 %v135_v56  ;;  %1241 = vmatpush3.bf16.msra.mxu1 %v1240_v5  ;;  %v1274_v56 = vpack.c.bf16 %v431_v55, %v430_v53  ;;  %v439_v5 = vld [vmem:[#allocation5 + $0x270] sm:$0xff]  ;;  %v630_v53 = vld [vmem:[#allocation5 + $0x3a8] sm:$0xff] }
 0x119   :  { %1243 = vmatprep.subr.bf16.mxu1 %v1242_v6  ;;  %v1286_v6 = vpack.c.bf16 %v439_v5, %v438_v4  ;;  %v635_v4 = vld [vmem:[#allocation5 + $0x3d0] sm:$0xff]  ;;  %v1328_v5 = vpack.c.bf16 %v617_v2, %v616_v63  ;;  %v734_v2 = vld [vmem:[#allocation5 + $0x488] sm:$0xff] }
 0x11c   :  { %1245 = vmatpush3.bf16.msra.mxu1 %v1244_v11 }
 0x11d   :  { %1247 = vmatprep.subr.bf16.mxu1 %v1246_v12  ;;  %v440_v12 = vld [vmem:[#allocation5 + $0x278] sm:$0xff] }
 0x11e   :  { %v1289_v14 = vpack.c.bf16 %v441_v13, %v440_v12  ;;  %v620_v13 = vld [vmem:[#allocation5 + $0x358] sm:$0xff] }
 0x120   :  { %1249 = vmatpush3.bf16.msra.mxu1 %v1248_v17  ;;  %v1292_v17 = vpack.c.bf16 %v443_v16, %v442_v15  ;;  %v638_v15 = vld [vmem:[#allocation5 + $0x3e8] sm:$0xff]  ;;  %v639_v16 = vld [vmem:[#allocation5 + $0x3f0] sm:$0xff] }
 0x121   :  { %1251 = vmatprep.subr.bf16.mxu1 %v1250_v18  ;;  %v520_v18 = vld [vmem:[#allocation5 + $0x298] sm:$0xff] }
 0x122   :  { %v1295_v21 = vpack.c.bf16 %v521_v19, %v520_v18  ;;  %v1338_v18 = vpack.c.bf16 %v639_v16, %v638_v15  ;;  %v622_v19 = vld [vmem:[#allocation5 + $0x368] sm:$0xff] }
 0x124   :  { %1253 = vmatpush3.bf16.msra.mxu1 %v1252_v23  ;;  %v1298_v23 = vpack.c.bf16 %v523_v22, %v522_v20  ;;  %v623_v20 = vld [vmem:[#allocation5 + $0x370] sm:$0xff]  ;;  %v641_v22 = vld [vmem:[#allocation5 + $0x400] sm:$0xff] }
 0x125   :  { %1255 = vmatprep.subr.bf16.mxu1 %v1254_v24  ;;  %v524_v24 = vld [vmem:[#allocation5 + $0x2b8] sm:$0xff] }
 0x126   :  { %v1301_v26 = vpack.c.bf16 %v525_v25, %v524_v24  ;;  %v624_v25 = vld [vmem:[#allocation5 + $0x378] sm:$0xff] }
 0x128   :  { %1257 = vmatpush3.bf16.msra.mxu1 %v1256_v29  ;;  %v1304_v29 = vpack.c.bf16 %v527_v28, %v526_v27  ;;  %v839_v28 = vld [vmem:[#allocation7 + $0x4] ss:$0 sm:$0xff] }
 0x129   :  { %1259 = vmatprep.subr.bf16.mxu1 %v1258_v30  ;;  %v528_v30 = vld [vmem:[#allocation5 + $0x2d8] sm:$0xff] }
 0x12a   :  { %v1307_v32 = vpack.c.bf16 %v529_v31, %v528_v30 }
 0x12c   :  { %1261 = vmatpush3.bf16.msra.mxu1 %v1260_v35  ;;  %v1310_v35 = vpack.c.bf16 %v531_v34, %v530_v33  ;;  %v642_v33 = vld [vmem:[#allocation5 + $0x408] sm:$0xff]  ;;  %v643_v34 = vld [vmem:[#allocation5 + $0x410] sm:$0xff] }
 0x12d   :  { %1263 = vmatprep.subr.bf16.mxu1 %v1262_v36  ;;  %v532_v36 = vld [vmem:[#allocation5 + $0x2f8] sm:$0xff] }
 0x12e   :  { %v1313_v38 = vpack.c.bf16 %v533_v37, %v532_v36  ;;  %v626_v36 = vld [vmem:[#allocation5 + $0x388] sm:$0xff]  ;;  %v627_v37 = vld [vmem:[#allocation5 + $0x390] sm:$0xff] }
 0x130   :  { %1265 = vmatpush3.bf16.msra.mxu1 %v1264_v39 }
 0x131   :  { %1267 = vmatprep.subr.bf16.mxu1 %v1266_v47  ;;  %v1316_v47 = vpack.c.bf16 %v535_v46, %v534_v45  ;;  %v724_v45 = vld [vmem:[#allocation5 + $0x438] sm:$0xff]  ;;  %v725_v46 = vld [vmem:[#allocation5 + $0x440] sm:$0xff] }
 0x134   :  { %1269 = vmatpush3.bf16.msra.mxu1 %v1268_v50  ;;  %v612_v50 = vld [vmem:[#allocation5 + $0x318] sm:$0xff] }
 0x135   :  { %1294 = vmatprep.subr.bf16.mxu1 %v1486_v0  ;;  %v1320_v55 = vpack.c.bf16 %v613_v52, %v612_v50  ;;  %v728_v50 = vld [vmem:[#allocation5 + $0x458] sm:$0xff] }
 0x1ea   :  { %v223_v41 = vpop.f32.mrb[0].mxu1 }
 0x1eb   :  { %v224_v42 = vadd.f32 %v836_v40, %v223_v41  ;;  %v1046_v43 = vpop.f32.mrb[1].mxu1  ;;  %v838_v40 = vld [vmem:[#allocation7 + $0x3] ss:$0 sm:$0xff] }
 0x1ed   :  { %v227_v44 = vmax.f32 %v224_v42, 0.0 }
 0x1ef   :  { %1080 = vmatmul.mubr.f32.vlgmr.msra.gmra.mrb[2].mxu0 %v227_v44 }
 0x1f0   :  { %1114 = vmatprep.mubr.msk.f32.mxu0 %vm1487_vm0, %v1488_v1  ;;  %1272 = vmatpush3.bf16.msra.mxu0 %v1271_v54  ;;  %v631_v54 = vld [vmem:[#allocation5 + $0x3b0] sm:$0xff] }
 0x1f1   :  { %1273 = vmatprep.subr.bf16.mxu0 %v1486_v0 }
 0x1f4   :  { %1275 = vmatpush3.bf16.msra.mxu0 %v1274_v56  ;;  %v1322_v56 = vpack.c.bf16 %v631_v54, %v630_v53  ;;  %v730_v53 = vld [vmem:[#allocation5 + $0x468] sm:$0xff]  ;;  %v731_v54 = vld [vmem:[#allocation5 + $0x470] sm:$0xff] }
 0x1f5   :  { %1276 = vmatprep.subr.bf16.mxu0 %v1486_v0 }
 0x1f8   :  { %1278 = vmatpush3.bf16.msra.mxu0 %v1277_v59  ;;  %v632_v59 = vld [vmem:[#allocation5 + $0x3b8] sm:$0xff] }
 0x1f9   :  { %1279 = vmatprep.subr.bf16.mxu0 %v1486_v0 }
 0x1fc   :  { %1281 = vmatpush3.bf16.msra.mxu0 %v1280_v62  ;;  %v1326_v62 = vpack.c.bf16 %v633_v60, %v632_v59 }
 0x1fd   :  { %1282 = vmatprep.subr.bf16.mxu0 %v1486_v0 }
 0x200   :  { %1284 = vmatpush3.bf16.msra.mxu0 %v1283_v3  ;;  %v634_v3 = vld [vmem:[#allocation5 + $0x3c8] sm:$0xff] }
 0x201   :  { %1285 = vmatprep.subr.bf16.mxu0 %v1486_v0 }
 0x204   :  { %1287 = vmatpush3.bf16.msra.mxu0 %v1286_v6  ;;  %v1330_v6 = vpack.c.bf16 %v635_v4, %v634_v3  ;;  %v735_v3 = vld [vmem:[#allocation5 + $0x490] sm:$0xff] }
 0x205   :  { %1288 = vmatprep.subr.bf16.mxu0 %v1486_v0  ;;  %v1372_v4 = vpack.c.bf16 %v735_v3, %v734_v2 }
 0x208   :  { %1290 = vmatpush3.bf16.msra.mxu0 %v1289_v14  ;;  %v621_v14 = vld [vmem:[#allocation5 + $0x360] sm:$0xff] }
 0x209   :  { %1291 = vmatprep.subr.bf16.mxu0 %v1486_v0 }
 0x20c   :  { %1293 = vmatpush3.bf16.msra.mxu0 %v1292_v17  ;;  %v1336_v17 = vpack.c.bf16 %v621_v14, %v620_v13 }
 0x20d   :  { %1319 = vmatprep.subr.bf16.mxu0 %v1318_v51  ;;  %v729_v51 = vld [vmem:[#allocation5 + $0x460] sm:$0xff] }
 0x20e   :  { %v1363_v52 = vpack.c.bf16 %v729_v51, %v728_v50 }
 0x2c2   :  { %v315_v8 = vpop.f32.mrb[2].mxu0 }
 0x2c3   :  { %v316_v9 = vadd.f32 %v837_v7, %v315_v8  ;;  %v1081_v10 = vpop.f32.mrb[3].mxu0  ;;  %v618_v7 = vld [vmem:[#allocation5 + $0x348] sm:$0xff]  ;;  %v619_v8 = vld [vmem:[#allocation5 + $0x350] sm:$0xff] }
 0x2c4   :  { %v637_v10 = vld [vmem:[#allocation5 + $0x3e0] sm:$0xff] }
 0x2c5   :  { %v319_v11 = vmax.f32 %v316_v9, 0.0  ;;  %v636_v9 = vld [vmem:[#allocation5 + $0x3d8] sm:$0xff] }
 0x2c6   :  { %v1334_v12 = vpack.c.bf16 %v637_v10, %v636_v9 }
 0x2c7   :  { %422 = vmatmul.mubr.f32.vlgmr.msra.gmra.mrb[2].mxu1 %v319_v11  ;;  %v1332_v11 = vpack.c.bf16 %v619_v8, %v618_v7 }
 0x2c8   :  { %1149 = vmatprep.mubr.msk.f32.mxu1 %vm1487_vm0, %v1488_v1  ;;  %1296 = vmatpush3.bf16.msra.mxu1 %v1295_v21  ;;  %v640_v21 = vld [vmem:[#allocation5 + $0x3f8] sm:$0xff] }
 0x2c9   :  { %1297 = vmatprep.subr.bf16.mxu1 %v1486_v0  ;;  %v1342_v24 = vpack.c.bf16 %v641_v22, %v640_v21 }
 0x2cc   :  { %1299 = vmatpush3.bf16.msra.mxu1 %v1298_v23  ;;  %v1340_v23 = vpack.c.bf16 %v623_v20, %v622_v19 }
 0x2cd   :  { %1300 = vmatprep.subr.bf16.mxu1 %v1486_v0 }
 0x2d0   :  { %1302 = vmatpush3.bf16.msra.mxu1 %v1301_v26  ;;  %v625_v26 = vld [vmem:[#allocation5 + $0x380] sm:$0xff] }
 0x2d1   :  { %1303 = vmatprep.subr.bf16.mxu1 %v1486_v0  ;;  %v1344_v27 = vpack.c.bf16 %v625_v26, %v624_v25 }
 0x2d4   :  { %1305 = vmatpush3.bf16.msra.mxu1 %v1304_v29 }
 0x2d5   :  { %1306 = vmatprep.subr.bf16.mxu1 %v1486_v0 }
 0x2d8   :  { %1308 = vmatpush3.bf16.msra.mxu1 %v1307_v32 }
 0x2d9   :  { %1309 = vmatprep.subr.bf16.mxu1 %v1486_v0 }
 0x2dc   :  { %1311 = vmatpush3.bf16.msra.mxu1 %v1310_v35  ;;  %v1346_v35 = vpack.c.bf16 %v643_v34, %v642_v33 }
 0x2dd   :  { %1312 = vmatprep.subr.bf16.mxu1 %v1486_v0 }
 0x2e0   :  { %1314 = vmatpush3.bf16.msra.mxu1 %v1313_v38  ;;  %v1348_v38 = vpack.c.bf16 %v627_v37, %v626_v36 }
 0x2e1   :  { %1315 = vmatprep.subr.bf16.mxu1 %v1486_v0 }
 0x2e4   :  { %1317 = vmatpush3.bf16.msra.mxu1 %v1316_v47  ;;  %v726_v47 = vld [vmem:[#allocation5 + $0x448] sm:$0xff] }
 0x2e5   :  { %1350 = vmatprep.subr.bf16.mxu1 %v1486_v0  ;;  %v1360_v49 = vpack.c.bf16 %v727_v48, %v726_v47 }
 0x39a   :  { %v914_v39 = vpop.f32.mrb[2].mxu1 }
 0x39b   :  { %v915_v41 = vpop.f32.mrb[3].mxu1 }
 0x39c   :  { %v916_v42 = vadd.f32 %v915_v41, %v914_v39  ;;  %v720_v39 = vld [vmem:[#allocation5 + $0x418] sm:$0xff]  ;;  %v722_v41 = vld [vmem:[#allocation5 + $0x428] sm:$0xff] }
 0x39e   :  { %v424_v43 = vadd.f32 %v916_v42, %v838_v40  ;;  %v721_v40 = vld [vmem:[#allocation5 + $0x420] sm:$0xff] }
 0x39f   :  { %v1351_v42 = vpack.c.bf16 %v721_v40, %v720_v39 }
 0x3a0   :  { %v427_v44 = vmax.f32 %v424_v43, 0.0  ;;  %v723_v43 = vld [vmem:[#allocation5 + $0x430] sm:$0xff] }
 0x3a2   :  { %1115 = vmatmul.mubr.f32.vlgmr.msra.gmra.mrb[4].mxu0 %v427_v44 }
 0x3a3   :  { %713 = vmatprep.mubr.f32.mxu0 %v427_v44  ;;  %1321 = vmatpush3.bf16.msra.mxu0 %v1320_v55  ;;  %v1354_v44 = vpack.c.bf16 %v723_v43, %v722_v41  ;;  %v1366_v55 = vpack.c.bf16 %v731_v54, %v730_v53 }
 0x3a4   :  { %1323 = vmatprep.subr.bf16.mxu0 %v1322_v56  ;;  %v840_v56 = vld [vmem:[#allocation7 + $0x5] ss:$0 sm:$0xff] }
 0x3a7   :  { %1325 = vmatpush3.bf16.msra.mxu0 %v1324_v61  ;;  %v732_v61 = vld [vmem:[#allocation5 + $0x478] sm:$0xff] }
 0x3a8   :  { %1327 = vmatprep.subr.bf16.mxu0 %v1326_v62  ;;  %v733_v62 = vld [vmem:[#allocation5 + $0x480] sm:$0xff] }
 0x3a9   :  { %v1369_v63 = vpack.c.bf16 %v733_v62, %v732_v61 }
 0x3ab   :  { %1329 = vmatpush3.bf16.msra.mxu0 %v1328_v5 }
 0x3ac   :  { %1331 = vmatprep.subr.bf16.mxu0 %v1330_v6  ;;  %v841_v6 = vld [vmem:[#allocation7 + $0x6] ss:$0 sm:$0xff] }
 0x3af   :  { %1333 = vmatpush3.bf16.msra.mxu0 %v1332_v11  ;;  %v842_v11 = vld [vmem:[#allocation7 + $0x7] ss:$0 sm:$0xff] }
 0x3b0   :  { %1335 = vmatprep.subr.bf16.mxu0 %v1334_v12 }
 0x3b3   :  { %1337 = vmatpush3.bf16.msra.mxu0 %v1336_v17 }
 0x3b4   :  { %1339 = vmatprep.subr.bf16.mxu0 %v1338_v18 }
 0x3b7   :  { %1341 = vmatpush3.bf16.msra.mxu0 %v1340_v23 }
 0x3b8   :  { %1343 = vmatprep.subr.bf16.mxu0 %v1342_v24 }
 0x3bb   :  { %1345 = vmatpush3.bf16.msra.mxu0 %v1344_v27 }
 0x3bc   :  { %1347 = vmatprep.subr.bf16.mxu0 %v1346_v35 }
 0x3bf   :  { %1349 = vmatpush3.bf16.msra.mxu0 %v1348_v38 }
 0x475   :  { %v515_v29 = vpop.f32.mrb[4].mxu0 }
 0x476   :  { %v516_v30 = vadd.f32 %v839_v28, %v515_v29  ;;  %v1116_v31 = vpop.f32.mrb[5].mxu0 }
 0x478   :  { %v519_v32 = vmax.f32 %v516_v30, 0.0 }
 0x47a   :  { %1150 = vmatmul.mubr.f32.vlgmr.msra.gmra.mrb[4].mxu1 %v519_v32 }
 0x47b   :  { %1184 = vmatprep.mubr.msk.f32.mxu1 %vm1487_vm0, %v1488_v1  ;;  %1352 = vmatpush3.bf16.msra.mxu1 %v1351_v42  ;;  %v1357_v1 = vpack.c.bf16 %v725_v46, %v724_v45 }
 0x47c   :  { %1353 = vmatprep.subr.bf16.mxu1 %v1486_v0 }
 0x47f   :  { %1355 = vmatpush3.bf16.msra.mxu1 %v1354_v44 }
 0x480   :  { %1356 = vmatprep.subr.bf16.mxu1 %v1486_v0 }
 0x483   :  { %1358 = vmatpush3.bf16.msra.mxu1 %v1357_v1 }
 0x484   :  { %1359 = vmatprep.subr.bf16.mxu1 %v1486_v0 }
 0x487   :  { %1361 = vmatpush3.bf16.msra.mxu1 %v1360_v49 }
 0x488   :  { %1362 = vmatprep.subr.bf16.mxu1 %v1486_v0 }
 0x48b   :  { %1364 = vmatpush3.bf16.msra.mxu1 %v1363_v52 }
 0x48c   :  { %1365 = vmatprep.subr.bf16.mxu1 %v1486_v0 }
 0x48f   :  { %1367 = vmatpush3.bf16.msra.mxu1 %v1366_v55 }
 0x490   :  { %1368 = vmatprep.subr.bf16.mxu1 %v1486_v0 }
 0x493   :  { %1370 = vmatpush3.bf16.msra.mxu1 %v1369_v63 }
 0x494   :  { %1371 = vmatprep.subr.bf16.mxu1 %v1486_v0 }
 0x497   :  { %1373 = vmatpush3.bf16.msra.mxu1 %v1372_v4 }
 0x54d   :  { %v607_v57 = vpop.f32.mrb[4].mxu1 }
 0x54e   :  { %v608_v58 = vadd.f32 %v840_v56, %v607_v57  ;;  %v1151_v59 = vpop.f32.mrb[5].mxu1 }
 0x550   :  { %v611_v60 = vmax.f32 %v608_v58, 0.0 }
 0x552   :  { %714 = vmatmul.mubr.f32.vlgmr.msra.gmra.mrb[6].mxu0 %v611_v60 }
 0x625   :  { %v983_v5 = vpop.f32.mrb[6].mxu0 }
 0x626   :  { %v984_v7 = vpop.f32.mrb[7].mxu0 }
 0x627   :  { %v985_v8 = vadd.f32 %v984_v7, %v983_v5 }
 0x629   :  { %v716_v9 = vadd.f32 %v985_v8, %v841_v6 }
 0x62b   :  { %v719_v10 = vmax.f32 %v716_v9, 0.0 }
 0x62d   :  { %1185 = vmatmul.mubr.f32.vlgmr.msra.gmra.mrb[6].mxu1 %v719_v10 }
 0x700   :  { %v807_v12 = vpop.f32.mrb[6].mxu1 }
 0x701   :  { %v808_v13 = vadd.f32 %v842_v11, %v807_v12  ;;  %v1186_v14 = vpop.f32.mrb[7].mxu1 }
 0x703   :  { %v843_v15 = vmul.f32 -1.442695, %v808_v13 }
 0x705   :  { %1383 = vpow2.f32 %v843_v15 }
 0x70f   :  { %v1384_v16 = vpop.eup %1383 }
 0x710   :  { %v814_v17 = vadd.f32 1.0, %v1384_v16 }
 0x712   :  { %1385 = vrcp.f32 %v814_v17 }
 0x71c   :  { %v1386_v0 = vpop.eup %1385 }
 0x71d   :  { %817 = vst [vmem:[#allocation8] sm:$0x3] %v1386_v0 }
 0x71e   :  { %1464 = shalt.err (!%p1461_p0)
}
 0x71f   :  { %s1465_s25 = scalar_lea.hbm %s1615_s3, 32 }
 0x720   :  { %p1466_p1 = scmp.ne.s32.totalorder %s1615_s3, %s1465_s25  ;;  %p1469_p2 = scmp.lt.u32.totalorder %s1465_s25, %s1615_s3 }
 0x722   :  { %p1471_p3 = pnand %p1469_p2, %p1466_p1 }
 0x724   :  { %1474 = shalt.err (!%p1471_p3)
}
 0x725   :  { %827 = dma.vmem_to_hbm [thread:$0]  %s825_s21, 32, %s1615_s3, [#allocation4]  }
 0x726   :  { %1479 = dma.done.wait [#allocation4], 32  }
 0x727   :  { %1480 = vsyncadd [#allocation4], 4294967264 }
 0x728   :  { %831 = vsyncpa [#allocation3], 1 }
 0x729   :  { %832 = vsyncpa [#allocation6], 1 }
 0x72a   :  { %833 = vsyncpa [#allocation4], 1 }

</bundles_post_ra>
